<compile_context>
chip_gen: v6e
topology: v6e:2x2x1
jax: 0.10.0
libtpu: 0.0.40
codegen_flags: <defaults>
</compile_context>

<pallas_src>
import functools

import jax
import jax.numpy as jnp
from jax.experimental import pallas as pl
from jax.experimental.pallas import tpu as pltpu


def gnn_kernel(x_ref, w0_ref, b0_ref, w1_ref, b1_ref, w2_ref, b2_ref, o_ref):
    # Layer 0: Linear + ReLU (f32 accumulation on the MXU, biases in f32).
    h = jnp.dot(x_ref[...], w0_ref[...], preferred_element_type=jnp.float32)
    h = jnp.maximum(h + b0_ref[...], 0.0)
    # Layer 1 (pre_out): Linear + ReLU.
    h = jnp.dot(h.astype(w1_ref.dtype), w1_ref[...],
                preferred_element_type=jnp.float32)
    h = jnp.maximum(h + b1_ref[...], 0.0)
    # Output layer: Linear + Tanh (output columns zero-padded to a lane-dense
    # width by the wrapper, so this store is an unmasked full-lane vst).
    h = jnp.dot(h.astype(w2_ref.dtype), w2_ref[...],
                preferred_element_type=jnp.float32)
    h = h + b2_ref[...]
    o_ref[...] = jnp.tanh(h).astype(o_ref.dtype)


def _round_up(n, m):
    return ((n + m - 1) // m) * m


@functools.partial(jax.jit, static_argnames=("row_tile", "compute_dtype"))
def gnn_forward(x, params, *, row_tile=512, compute_dtype=jnp.float32):
    """Run the GNN forward pass. x: (B, in_size) f32. Returns (B, out_size) f32."""
    (w0, b0), (w1, b1), (w2, b2) = params
    B, in_size = x.shape
    out_size = w2.shape[1]

    # ---- Lane-dense output: pad the output feature dim to a multiple of 128.
    out_pad = max(128, _round_up(out_size, 128))
    if out_pad != out_size:
        w2 = jnp.zeros((w2.shape[0], out_pad), w2.dtype).at[:, :out_size].set(w2)
        b2 = jnp.zeros((1, out_pad), b2.dtype).at[:, :out_size].set(b2)

    # ---- Matmul operands optionally in bf16; biases / accumulation stay f32.
    xc = x.astype(compute_dtype)
    w0c = w0.astype(compute_dtype)
    w1c = w1.astype(compute_dtype)
    w2c = w2.astype(compute_dtype)

    # ---- Row (batch) tiling: TM is a multiple of 8; pad B up to a multiple of TM.
    tm = min(int(row_tile), max(8, _round_up(B, 8)))
    tm = _round_up(tm, 8)
    b_pad = _round_up(B, tm)
    if b_pad != B:
        xc = jnp.pad(xc, ((0, b_pad - B), (0, 0)))

    grid = (b_pad // tm,)

    def resident(arr):
        # Same block index every grid step -> DMA'd once, stays in VMEM.
        return pl.BlockSpec(arr.shape, lambda i: (0, 0))

    out = pl.pallas_call(
        gnn_kernel,
        out_shape=jax.ShapeDtypeStruct((b_pad, out_pad), jnp.float32),
        grid=grid,
        in_specs=[
            pl.BlockSpec((tm, in_size), lambda i: (i, 0)),   # x rows (pipelined)
            resident(w0c), resident(b0),
            resident(w1c), resident(b1),
            resident(w2c), resident(b2),
        ],
        out_specs=pl.BlockSpec((tm, out_pad), lambda i: (i, 0)),
        compiler_params=pltpu.CompilerParams(
            dimension_semantics=("parallel",),
            # Tiles here are tiny (< a few MiB even at TM=2048); default scoped
            # VMEM limits are sufficient on v5e/v6e/v7x, so no vmem_limit_bytes.
        ),
    )(xc, w0c, b0, w1c, b1, w2c, b2)

    # Strip batch padding and the lane-dense output padding.
    return out[:B, :out_size]


def init_linear(key, fan_in, fan_out):
    """Mimic torch.nn.Linear default init (uniform +-1/sqrt(fan_in))."""
    kw, kb = jax.random.split(key)
    bound = 1.0 / jnp.sqrt(jnp.float32(fan_in))
    # Stored as (in, out) so the kernel computes x @ W.
    w = jax.random.uniform(kw, (fan_in, fan_out), jnp.float32, -bound, bound)
    b = jax.random.uniform(kb, (1, fan_out), jnp.float32, -bound, bound)
    return w, b


def reference_forward(x, params):
    (w0, b0), (w1, b1), (w2, b2) = params
    h = jnp.maximum(x @ w0 + b0, 0.0)
    h = jnp.maximum(h @ w1 + b1, 0.0)
    return jnp.tanh(h @ w2 + b2)


if __name__ == "__main__":
    in_size, hidden, out_size = 32, 64, 16

    key = jax.random.PRNGKey(0)
    kx, kx2, k0, k1, k2 = jax.random.split(key, 5)

    params = (
        init_linear(k0, in_size, hidden),   # dense0
        init_linear(k1, hidden, hidden),    # pre_out1
        init_linear(k2, hidden, out_size),  # output
    )

    # Small batch (single grid step, padded rows).
    x_small = jax.random.normal(kx, (8, in_size), jnp.float32)
    out_small = jax.block_until_ready(gnn_forward(x_small, params))
    ref_small = reference_forward(x_small, params)
    assert out_small.shape == (8, out_size)
    assert jnp.allclose(out_small, ref_small, atol=1e-5, rtol=1e-5)

    # Larger batch exercising multiple grid steps + batch padding (300 -> 384).
    x_big = jax.random.normal(kx2, (300, in_size), jnp.float32)
    out_big = jax.block_until_ready(gnn_forward(x_big, params, row_tile=128))
    ref_big = reference_forward(x_big, params)
    assert out_big.shape == (300, out_size)
    assert jnp.allclose(out_big, ref_big, atol=1e-5, rtol=1e-5)

    # bf16 matmul-operand path (f32 accumulation) — looser tolerance.
    out_bf16 = jax.block_until_ready(
        gnn_forward(x_big, params, row_tile=128, compute_dtype=jnp.bfloat16))
    assert jnp.allclose(out_bf16, ref_big, atol=2e-2, rtol=2e-2)

    print("KERNEL_OK")
</pallas_src>

<mosaic_0001>
module attributes {stable_mosaic.version = 11 : i64} {
  func.func @gnn_kernel(%arg0: i32, %arg1: memref<8x32xf32, #tpu.memory_space<vmem>>, %arg2: memref<32x64xf32, #tpu.memory_space<vmem>>, %arg3: memref<1x64xf32, #tpu.memory_space<vmem>>, %arg4: memref<64x64xf32, #tpu.memory_space<vmem>>, %arg5: memref<1x64xf32, #tpu.memory_space<vmem>>, %arg6: memref<64x128xf32, #tpu.memory_space<vmem>>, %arg7: memref<1x128xf32, #tpu.memory_space<vmem>>, %arg8: memref<8x128xf32, #tpu.memory_space<vmem>>) attributes {dimension_semantics = [#tpu.dimension_semantics<parallel>], iteration_bounds = array<i64: 1>, scalar_prefetch = 0 : i64, scratch_operands = 0 : i64, tpu.core_type = #tpu.core_type<tc>, window_params = [{transform_indices = @transform_0, window_bounds = array<i64: 8, 32>}, {pipeline_mode = #tpu.pipeline_mode<synchronous>, transform_indices = @transform_1, window_bounds = array<i64: 32, 64>}, {pipeline_mode = #tpu.pipeline_mode<synchronous>, transform_indices = @transform_2, window_bounds = array<i64: 1, 64>}, {pipeline_mode = #tpu.pipeline_mode<synchronous>, transform_indices = @transform_3, window_bounds = array<i64: 64, 64>}, {pipeline_mode = #tpu.pipeline_mode<synchronous>, transform_indices = @transform_4, window_bounds = array<i64: 1, 64>}, {pipeline_mode = #tpu.pipeline_mode<synchronous>, transform_indices = @transform_5, window_bounds = array<i64: 64, 128>}, {pipeline_mode = #tpu.pipeline_mode<synchronous>, transform_indices = @transform_6, window_bounds = array<i64: 1, 128>}, {transform_indices = @transform_7, window_bounds = array<i64: 8, 128>}]} {
    %c0 = arith.constant 0 : index
    %c0_0 = arith.constant 0 : index
    %0 = vector.load %arg1[%c0, %c0_0] : memref<8x32xf32, #tpu.memory_space<vmem>>, vector<8x32xf32>
    %c0_1 = arith.constant 0 : index
    %c0_2 = arith.constant 0 : index
    %1 = vector.load %arg2[%c0_1, %c0_2] : memref<32x64xf32, #tpu.memory_space<vmem>>, vector<32x64xf32>
    %cst = arith.constant dense<0.000000e+00> : vector<8x64xf32>
    %2 = tpu.matmul %0, %1, %cst {dimension_numbers = #tpu.dot_dimension_numbers<[1], [0], [0], [1], [0, 0, 1, 1], [], []>} : vector<8x32xf32>, vector<32x64xf32>, vector<8x64xf32> -> vector<8x64xf32>
    %c0_3 = arith.constant 0 : index
    %c0_4 = arith.constant 0 : index
    %3 = vector.load %arg3[%c0_3, %c0_4] : memref<1x64xf32, #tpu.memory_space<vmem>>, vector<1x64xf32>
    %4 = vector.broadcast %3 : vector<1x64xf32> to vector<8x64xf32>
    %5 = arith.addf %2, %4 : vector<8x64xf32>
    %cst_5 = arith.constant 0.000000e+00 : f32
    %6 = vector.broadcast %cst_5 : f32 to vector<8x64xf32>
    %7 = arith.maximumf %5, %6 : vector<8x64xf32>
    %c0_6 = arith.constant 0 : index
    %c0_7 = arith.constant 0 : index
    %8 = vector.load %arg4[%c0_6, %c0_7] : memref<64x64xf32, #tpu.memory_space<vmem>>, vector<64x64xf32>
    %cst_8 = arith.constant dense<0.000000e+00> : vector<8x64xf32>
    %9 = tpu.matmul %7, %8, %cst_8 {dimension_numbers = #tpu.dot_dimension_numbers<[1], [0], [0], [1], [0, 0, 1, 1], [], []>} : vector<8x64xf32>, vector<64x64xf32>, vector<8x64xf32> -> vector<8x64xf32>
    %c0_9 = arith.constant 0 : index
    %c0_10 = arith.constant 0 : index
    %10 = vector.load %arg5[%c0_9, %c0_10] : memref<1x64xf32, #tpu.memory_space<vmem>>, vector<1x64xf32>
    %11 = vector.broadcast %10 : vector<1x64xf32> to vector<8x64xf32>
    %12 = arith.addf %9, %11 : vector<8x64xf32>
    %cst_11 = arith.constant 0.000000e+00 : f32
    %13 = vector.broadcast %cst_11 : f32 to vector<8x64xf32>
    %14 = arith.maximumf %12, %13 : vector<8x64xf32>
    %c0_12 = arith.constant 0 : index
    %c0_13 = arith.constant 0 : index
    %15 = vector.load %arg6[%c0_12, %c0_13] : memref<64x128xf32, #tpu.memory_space<vmem>>, vector<64x128xf32>
    %cst_14 = arith.constant dense<0.000000e+00> : vector<8x128xf32>
    %16 = tpu.matmul %14, %15, %cst_14 {dimension_numbers = #tpu.dot_dimension_numbers<[1], [0], [0], [1], [0, 0, 1, 1], [], []>} : vector<8x64xf32>, vector<64x128xf32>, vector<8x128xf32> -> vector<8x128xf32>
    %c0_15 = arith.constant 0 : index
    %c0_16 = arith.constant 0 : index
    %17 = vector.load %arg7[%c0_15, %c0_16] : memref<1x128xf32, #tpu.memory_space<vmem>>, vector<1x128xf32>
    %18 = vector.broadcast %17 : vector<1x128xf32> to vector<8x128xf32>
    %19 = arith.addf %16, %18 : vector<8x128xf32>
    %20 = math.tanh %19 : vector<8x128xf32>
    %c0_17 = arith.constant 0 : index
    %c0_18 = arith.constant 0 : index
    %21 = vector.load %arg8[%c0_17, %c0_18] : memref<8x128xf32, #tpu.memory_space<vmem>>, vector<8x128xf32>
    tpu.vector_store %arg8[%c0_17, %c0_18], %20 {strides = array<i32>} : memref<8x128xf32, #tpu.memory_space<vmem>>, vector<8x128xf32>,
    return
  }
  func.func @transform_0(%arg0: i32) -> (i32, i32) {
    %c0_i32 = arith.constant 0 : i32
    %c0_i32_0 = arith.constant 0 : i32
    return %arg0, %c0_i32 : i32, i32
  }
  func.func @transform_1(%arg0: i32) -> (i32, i32) {
    %c0_i32 = arith.constant 0 : i32
    %c0_i32_0 = arith.constant 0 : i32
    %c0_i32_1 = arith.constant 0 : i32
    return %c0_i32, %c0_i32_0 : i32, i32
  }
  func.func @transform_2(%arg0: i32) -> (i32, i32) {
    %c0_i32 = arith.constant 0 : i32
    %c0_i32_0 = arith.constant 0 : i32
    %c0_i32_1 = arith.constant 0 : i32
    return %c0_i32, %c0_i32_0 : i32, i32
  }
  func.func @transform_3(%arg0: i32) -> (i32, i32) {
    %c0_i32 = arith.constant 0 : i32
    %c0_i32_0 = arith.constant 0 : i32
    %c0_i32_1 = arith.constant 0 : i32
    return %c0_i32, %c0_i32_0 : i32, i32
  }
  func.func @transform_4(%arg0: i32) -> (i32, i32) {
    %c0_i32 = arith.constant 0 : i32
    %c0_i32_0 = arith.constant 0 : i32
    %c0_i32_1 = arith.constant 0 : i32
    return %c0_i32, %c0_i32_0 : i32, i32
  }
  func.func @transform_5(%arg0: i32) -> (i32, i32) {
    %c0_i32 = arith.constant 0 : i32
    %c0_i32_0 = arith.constant 0 : i32
    %c0_i32_1 = arith.constant 0 : i32
    return %c0_i32, %c0_i32_0 : i32, i32
  }
  func.func @transform_6(%arg0: i32) -> (i32, i32) {
    %c0_i32 = arith.constant 0 : i32
    %c0_i32_0 = arith.constant 0 : i32
    %c0_i32_1 = arith.constant 0 : i32
    return %c0_i32, %c0_i32_0 : i32, i32
  }
  func.func @transform_7(%arg0: i32) -> (i32, i32) {
    %c0_i32 = arith.constant 0 : i32
    %c0_i32_0 = arith.constant 0 : i32
    return %arg0, %c0_i32 : i32, i32
  }
}

</mosaic_0001>

<bundles_post_ra>
// kernel: gnn_forward.1
= control target key start
LH: loop header
LB: loop body
LE: loop exit
PB: predicated region body
PF: predicated region fallthrough
CT: control target
= control target key end

     0   :  { %v413_v1 = vmov 0.0   ;;  %vm414_vm0 = vmmov 0   ;;  %s559_s0 = inlined_call_operand.vmem [shape: f32[8,32], index: 0, kind: input, shape index: {}]   ;;  %s560_s1 = inlined_call_operand.vmem [shape: f32[32,64], index: 1, kind: input, shape index: {}]   ;;  %s561_s2 = inlined_call_operand.vmem [shape: f32[1,64], index: 2, kind: input, shape index: {}]   ;;  %s562_s3 = inlined_call_operand.vmem [shape: f32[64,64], index: 3, kind: input, shape index: {}]   ;;  %s563_s4 = inlined_call_operand.vmem [shape: f32[1,64], index: 4, kind: input, shape index: {}]   ;;  %s564_s5 = inlined_call_operand.vmem [shape: f32[64,128], index: 5, kind: input, shape index: {}]   ;;  %s565_s6 = inlined_call_operand.vmem [shape: f32[1,128], index: 6, kind: input, shape index: {}]   ;;  %s566_s7 = inlined_call_operand.hbm [shape: f32[8,128], index: 7, kind: output, shape index: {}]  }
   0x1   :  { %v31_v0 = vld [vmem:[%s560_s1 + $0x18] sm:$0xff]  ;;  %337 = vmatprep.subr.mxu0 %v413_v1  ;;  %v30_v2 = vld [vmem:[%s560_s1 + $0x10] sm:$0xff]  ;;  %345 = vmatprep.mubr.msk.f32.mxu0 %vm414_vm0, %v413_v1  ;;  %v29_v5 = vld [vmem:[%s560_s1 + $0x8] sm:$0xff] }
   0x2   :  { %v121_v3 = vld [vmem:[%s562_s3 + $0x38] sm:$0xff]  ;;  %338 = vmatpush3.msra.mxu0 %v31_v0  ;;  %348 = vmatprep.subr.mxu1 %v413_v1  ;;  %v120_v4 = vld [vmem:[%s562_s3 + $0x30] sm:$0xff] }
   0x3   :  { %339 = vmatprep.subr.mxu0 %v413_v1  ;;  %349 = vmatpush3.msra.mxu1 %v121_v3 }
   0x4   :  { %12 = vsyncpa [#allocation3], 0  ;;  %340 = vmatpush3.msra.mxu0 %v30_v2  ;;  %350 = vmatprep.subr.mxu1 %v413_v1  ;;  %v119_v6 = vld [vmem:[%s562_s3 + $0x28] sm:$0xff]  ;;  %v28_v7 = vld [vmem:[%s560_s1] sm:$0xff]  ;;  %vm39_vm1 = vcmask 261120   ;;  %vm129_vm2 = vcmask 523264  }
   0x5   :  { %341 = vmatprep.subr.mxu0 %v413_v1  ;;  %351 = vmatpush3.msra.mxu1 %v120_v4  ;;  %v27_v8 = vld [vmem:[%s559_s0] sm:$0xff]  ;;  %v117_v10 = vld [vmem:[%s562_s3 + $0x18] sm:$0xff]  ;;  %v116_v11 = vld [vmem:[%s562_s3 + $0x10] sm:$0xff] }
   0x6   :  { %342 = vmatpush3.msra.mxu0 %v29_v5  ;;  %352 = vmatprep.subr.mxu1 %v413_v1  ;;  %v118_v9 = vld [vmem:[%s562_s3 + $0x20] sm:$0xff]  ;;  %v115_v12 = vld [vmem:[%s562_s3 + $0x8] sm:$0xff]  ;;  %v211_v14 = vld [vmem:[%s564_s5 + $0x38] sm:$0xff] }
   0x7   :  { %343 = vmatprep.subr.mxu0 %v413_v1  ;;  %353 = vmatpush3.msra.mxu1 %v119_v6  ;;  %v114_v13 = vld [vmem:[%s562_s3] sm:$0xff]  ;;  %v210_v15 = vld [vmem:[%s564_s5 + $0x30] sm:$0xff]  ;;  %v209_v16 = vld [vmem:[%s564_s5 + $0x28] sm:$0xff] }
   0x8   :  { %344 = vmatpush3.msra.mxu0 %v28_v7  ;;  %354 = vmatprep.subr.mxu1 %v413_v1  ;;  %v208_v17 = vld [vmem:[%s564_s5 + $0x20] sm:$0xff]  ;;  %v207_v18 = vld [vmem:[%s564_s5 + $0x18] sm:$0xff]  ;;  %v206_v24 = vld [vmem:[%s564_s5 + $0x10] sm:$0xff] }
   0x9   :  { %346 = vmatmul.mubr.msk.f32.vlgmr.msra.gmra.mxu0 %vm39_vm1, %v27_v8  ;;  %355 = vmatpush3.msra.mxu1 %v118_v9  ;;  %v308_v19 = vld [vmem:[%s561_s2] ss:$0 sm:$0xff]  ;;  %v205_v25 = vld [vmem:[%s564_s5 + $0x8] sm:$0xff] }
   0xa   :  { %356 = vmatprep.subr.mxu1 %v413_v1  ;;  %364 = vmatprep.mubr.msk.f32.mxu1 %vm414_vm0, %v413_v1  ;;  %v204_v26 = vld [vmem:[%s564_s5] sm:$0xff]  ;;  %s415_s5 = smov [#allocation2]  }
   0xb   :  { %357 = vmatpush3.msra.mxu1 %v117_v10  ;;  %367 = vmatprep.subr.mxu0 %v413_v1  ;;  %v310_v27 = vld [vmem:[%s563_s4] ss:$0 sm:$0xff]  ;;  %s300_s20 = sshll.u32 %s415_s5, 4  ;;  %s301_s20 = int_to_ptr.vmem [resolvable:$true] %s300_s20 }
   0xc   :  { %358 = vmatprep.subr.mxu1 %v413_v1  ;;  %383 = vmatprep.mubr.msk.f32.mxu0 %vm414_vm0, %v413_v1  ;;  %v312_v32 = vld [vmem:[%s565_s6] ss:$0 sm:$0xff]  ;;  %s391_s4 = scalar_lea.vmem %s301_s20, 128  ;;  %p396_p1 = scmp.lt.s32.totalorder %s301_s20, %s301_s20 }
   0xd   :  { %359 = vmatpush3.msra.mxu1 %v116_v11  ;;  %368 = vmatpush3.msra.mxu0 %v211_v14  ;;  %p392_p0 = scmp.ne.s32.totalorder %s301_s20, %s391_s4  ;;  %p397_p2 = scmp.lt.s32.totalorder %s391_s4, %s391_s4 }
   0xe   :  { %360 = vmatprep.subr.mxu1 %v413_v1  ;;  %369 = vmatprep.subr.mxu0 %v413_v1 }
   0xf   :  { %361 = vmatpush3.msra.mxu1 %v115_v12  ;;  %370 = vmatpush3.msra.mxu0 %v210_v15  ;;  %p398_p3 = por %p397_p2, %p396_p1 }
  0x10   :  { %362 = vmatprep.subr.mxu1 %v413_v1  ;;  %371 = vmatprep.subr.mxu0 %v413_v1 }
  0x11   :  { %363 = vmatpush3.msra.mxu1 %v114_v13  ;;  %372 = vmatpush3.msra.mxu0 %v209_v16  ;;  %p399_p4 = pnand %p398_p3, %p392_p0 }
  0x12   :  { %373 = vmatprep.subr.mxu0 %v413_v1 }
  0x13   :  { %374 = vmatpush3.msra.mxu0 %v208_v17 }
  0x14   :  { %375 = vmatprep.subr.mxu0 %v413_v1 }
  0x15   :  { %376 = vmatpush3.msra.mxu0 %v207_v18 }
  0x16   :  { %377 = vmatprep.subr.mxu0 %v413_v1 }
  0x17   :  { %378 = vmatpush3.msra.mxu0 %v206_v24 }
  0x18   :  { %379 = vmatprep.subr.mxu0 %v413_v1 }
  0x19   :  { %380 = vmatpush3.msra.mxu0 %v205_v25 }
  0x1a   :  { %381 = vmatprep.subr.mxu0 %v413_v1 }
  0x1b   :  { %382 = vmatpush3.msra.mxu0 %v204_v26 }
  0xc9   :  { %v109_v20 = vpop.f32.mrf.mxu0 }
  0xca   :  { %v110_v21 = vadd.f32 %v308_v19, %v109_v20 }
  0xcb   :  { %v347_v22 = vpop.f32.mrf.mxu0 }
  0xcc   :  { %v113_v23 = vmax.f32 %v110_v21, 0.0 }
  0xce   :  { %365 = vmatmul.mubr.msk.f32.vlgmr.msra.gmra.mxu1 %vm129_vm2, %v113_v23 }
 0x18e   :  { %v199_v28 = vpop.f32.mrf.mxu1 }
 0x18f   :  { %v200_v29 = vadd.f32 %v310_v27, %v199_v28 }
 0x190   :  { %v366_v30 = vpop.f32.mrf.mxu1 }
 0x191   :  { %v203_v31 = vmax.f32 %v200_v29, 0.0 }
 0x193   :  { %384 = vmatmul.mubr.msk.f32.vlgmr.msra.gmra.mxu0 %vm129_vm2, %v203_v31 }
 0x253   :  { %v288_v33 = vpop.f32.mrf.mxu0 }
 0x254   :  { %v289_v34 = vadd.f32 %v312_v32, %v288_v33 }
 0x255   :  { %v385_v35 = vpop.f32.mrf.mxu0 }
 0x256   :  { %389 = vtanh.f32 %v289_v34 }
 0x263   :  { %v390_v36 = vpop.eup %389 }
 0x264   :  { %293 = vst [vmem:[#allocation2] sm:$0xff] %v390_v36 }
 0x265   :  { %402 = shalt.err (!%p399_p4)
}
 0x266   :  { %303 = dma.vmem_to_hbm [thread:$0]  %s301_s20, 128, %s566_s7, [#allocation3]  }
 0x267   :  { %411 = dma.done.wait [#allocation3], 128  }
 0x268   :  { %412 = vsyncadd [#allocation3], 4294967168 }
 0x269   :  { %307 = vsyncpa [#allocation3], 1 }

</bundles_post_ra>
